<compile_context>
chip_gen: v5e
topology: v5e:2x2
jax: 0.10.0
libtpu: 0.0.40
codegen_flags: <defaults>
</compile_context>

<pallas_src>
import functools

import jax
import jax.numpy as jnp
from jax import lax
from jax.experimental import pallas as pl
from jax.experimental.pallas import tpu as pltpu

_MIN_VMEM_LIMIT = 32 * 1024 * 1024       # above v5e's 16 MiB scoped default
_MAX_VMEM_LIMIT = 48 * 1024 * 1024       # headroom under v7x's 64 MiB physical VMEM
_TILE_VMEM_BUDGET = 36 * 1024 * 1024     # per-grid-step footprint cap


def _round_up(x, m):
    return (x + m - 1) // m * m


# ---------------------------------------------------------------------------
# Phase A: one streaming reduction over item-row tiles producing BOTH
#   lat1 = i_hyp_t @ item_embs   (H, D)   and   gram = i_hyp_t @ i_hyp_t.T (H, H)
# ---------------------------------------------------------------------------
def _lat_gram_kernel(hyp_ref, x_ref, lat_ref, gram_ref, lat_acc, gram_acc):
    k = pl.program_id(1)

    @pl.when(k == 0)
    def _():
        lat_acc[...] = jnp.zeros_like(lat_acc)
        gram_acc[...] = jnp.zeros_like(gram_acc)

    hyp = hyp_ref[...]                                   # (H_p, TN), lane-dense
    lat_acc[...] += lax.dot_general(
        hyp, x_ref[...],
        dimension_numbers=(((1,), (0,)), ((), ())),
        preferred_element_type=jnp.float32)              # (H_p, D_p)
    gram_acc[...] += lax.dot_general(
        hyp, hyp,
        dimension_numbers=(((1,), (1,)), ((), ())),
        preferred_element_type=jnp.float32)              # (H_p, H_p)

    @pl.when(k == pl.num_programs(1) - 1)
    def _():
        lat_ref[0] = lat_acc[...]
        gram_ref[0] = gram_acc[...]


def _lat_and_gram(hyp_t, x, tile_n, n_splits, vmem_limit):
    h_p, n_p = hyp_t.shape
    d_p = x.shape[1]
    tiles_per_split = n_p // (tile_n * n_splits)
    lat_p, gram_p = pl.pallas_call(
        _lat_gram_kernel,
        out_shape=(jax.ShapeDtypeStruct((n_splits, h_p, d_p), jnp.float32),
                   jax.ShapeDtypeStruct((n_splits, h_p, h_p), jnp.float32)),
        grid_spec=pltpu.PrefetchScalarGridSpec(
            num_scalar_prefetch=0,
            grid=(n_splits, tiles_per_split),
            in_specs=[
                pl.BlockSpec((h_p, tile_n),
                             lambda s, k: (0, s * tiles_per_split + k)),
                pl.BlockSpec((tile_n, d_p),
                             lambda s, k: (s * tiles_per_split + k, 0)),
            ],
            out_specs=[pl.BlockSpec((1, h_p, d_p), lambda s, k: (s, 0, 0)),
                       pl.BlockSpec((1, h_p, h_p), lambda s, k: (s, 0, 0))],
            scratch_shapes=[pltpu.VMEM((h_p, d_p), jnp.float32),
                            pltpu.VMEM((h_p, h_p), jnp.float32)]),
        # TODO(synk): verify on v7x that "parallel" shards the split axis across
        # both TensorCores; if not, switch it to pltpu.CORE_PARALLEL.
        compiler_params=pltpu.CompilerParams(
            dimension_semantics=("parallel", "arbitrary"),
            vmem_limit_bytes=vmem_limit),
    )(hyp_t, x)
    # Per-split partials are tiny (H_p x D_p / H_p x H_p): sum in plain jnp.
    return lat_p.sum(axis=0), gram_p.sum(axis=0)


# ---------------------------------------------------------------------------
# Phase B/C: row-parallel  out_rows = hyp.T @ lat  (hyp stored transposed).
# Contraction depth is only H_p (<< MXU depth) but the pass is HBM-bound, so
# MXU utilisation is irrelevant; lat is f32 and cast to the MXU dtype here.
# ---------------------------------------------------------------------------
def _rows_kernel(hyp_ref, lat_ref, out_ref):
    out_ref[...] = lax.dot_general(
        hyp_ref[...], lat_ref[...].astype(hyp_ref.dtype),
        dimension_numbers=(((0,), (0,)), ((), ())),
        preferred_element_type=jnp.float32).astype(out_ref.dtype)


def _rows_matmul(hyp_t, lat, tile_n, out_dtype, vmem_limit):
    h_p, n_p = hyp_t.shape
    d_p = lat.shape[1]
    return pl.pallas_call(
        _rows_kernel,
        out_shape=jax.ShapeDtypeStruct((n_p, d_p), out_dtype),
        grid_spec=pltpu.PrefetchScalarGridSpec(
            num_scalar_prefetch=0,
            grid=(n_p // tile_n,),
            in_specs=[pl.BlockSpec((h_p, tile_n), lambda i: (0, i)),
                      pl.BlockSpec((h_p, d_p), lambda i: (0, 0))],
            out_specs=pl.BlockSpec((tile_n, d_p), lambda i: (i, 0))),
        compiler_params=pltpu.CompilerParams(
            dimension_semantics=("parallel",),
            vmem_limit_bytes=vmem_limit),
    )(hyp_t, lat)


# ---------------------------------------------------------------------------
# VMEM footprint model and tile selection.
# ---------------------------------------------------------------------------
def _phase_a_bytes(h_p, d_p, tile_n, cd_bytes):
    # double-buffered input tiles + f32 scratch accumulators + (tiny) outputs
    return (2 * (h_p * tile_n + tile_n * d_p) * cd_bytes
            + (h_p * d_p + h_p * h_p) * 4
            + 2 * (h_p * d_p + h_p * h_p) * 4)


def _phase_b_bytes(h_p, d_p, tile_n, cd_bytes, out_bytes):
    # double-buffered hyp tile + resident f32 lat + double-buffered output tile
    return (2 * h_p * tile_n * cd_bytes
            + 2 * h_p * d_p * 4
            + 2 * tile_n * d_p * out_bytes)


def _pick_tile(n_rows, row_tile, footprint_fn):
    tile = min(row_tile, _round_up(max(n_rows, 1), 128))
    tile = _round_up(tile, 128)
    while tile > 128 and footprint_fn(tile) > _TILE_VMEM_BUDGET:
        tile = max(128, _round_up(tile // 2, 128))
    return tile


# ---------------------------------------------------------------------------
# Public wrapper: HGNNLayer.forward -> (u_ret, i_ret)
# ---------------------------------------------------------------------------
def hgnn_layer(i_hyper, u_hyper, item_embs, n_hyper_layer, *,
               row_tile=2048, compute_dtype=jnp.bfloat16, lat_splits=2):
    if n_hyper_layer < 1:
        raise ValueError("n_hyper_layer must be >= 1 (the reference would return "
                         "an undefined u_ret otherwise).")
    if row_tile % 128 != 0:
        raise ValueError("row_tile must be a multiple of 128.")
    if lat_splits < 1:
        raise ValueError("lat_splits must be >= 1.")

    n_items, n_hyper = i_hyper.shape
    n_users, _ = u_hyper.shape
    _, dim = item_embs.shape
    out_dtype = item_embs.dtype
    cd = jnp.dtype(compute_dtype)
    cd_bytes = cd.itemsize
    out_bytes = jnp.dtype(out_dtype).itemsize

    # Padded sizes: lane dims to multiples of 128, H to a sublane-friendly 16.
    h_p = _round_up(n_hyper, 16)
    d_p = _round_up(dim, 128)

    # Row tiles: as large as the per-step VMEM budget allows (default 2048).
    tile_i = _pick_tile(
        n_items, row_tile,
        lambda t: max(_phase_a_bytes(h_p, d_p, t, cd_bytes),
                      _phase_b_bytes(h_p, d_p, t, cd_bytes, out_bytes)))
    tile_u = _pick_tile(
        n_users, row_tile,
        lambda t: _phase_b_bytes(h_p, d_p, t, cd_bytes, out_bytes))

    # Split phase A's reduction only when there are enough row tiles for it.
    n_splits = (lat_splits
                if _round_up(n_items, tile_i) // tile_i >= 2 * lat_splits else 1)
    n_i_p = _round_up(n_items, tile_i * n_splits)
    n_u_p = _round_up(n_users, tile_u)

    est = max(_phase_a_bytes(h_p, d_p, tile_i, cd_bytes),
              _phase_b_bytes(h_p, d_p, tile_i, cd_bytes, out_bytes),
              _phase_b_bytes(h_p, d_p, tile_u, cd_bytes, out_bytes))
    vmem_limit = int(min(_MAX_VMEM_LIMIT, max(_MIN_VMEM_LIMIT, est + (8 << 20))))

    # Lane-dense transposed hyper matrices (H_pad, N_pad) in the MXU compute
    # dtype; zero padding keeps padded rows/cols exactly zero everywhere.
    # TODO(synk): hoist/cache this transpose+pad across training steps — it costs
    # roughly one extra HBM read+write of each hyper matrix per call.
    i_hyp_t = jnp.zeros((h_p, n_i_p), cd).at[:n_hyper, :n_items].set(
        i_hyper.astype(cd).T)
    u_hyp_t = jnp.zeros((h_p, n_u_p), cd).at[:n_hyper, :n_users].set(
        u_hyper.astype(cd).T)
    x0 = jnp.zeros((n_i_p, d_p), cd).at[:n_items, :dim].set(item_embs.astype(cd))

    # Phase A: lat_1 and the Gram matrix in ONE pass over the item rows (f32).
    lat, gram = _lat_and_gram(i_hyp_t, x0, tile_i, n_splits, vmem_limit)

    # lat_L = gram^(L-1) @ lat_1 : tiny (H,H)x(H,D) f32 matmuls — plain jnp.
    for _ in range(n_hyper_layer - 1):
        lat = jnp.matmul(gram, lat, precision=lax.Precision.HIGHEST)

    # Phase B/C: one row-parallel pass each for the final i_ret and u_ret.
    # TODO(synk): on v5e/v6e (128 MiB VMEM) a fused variant could keep i_hyp_t
    # VMEM-resident across phases A and B to drop one of its two HBM reads.
    i_ret = _rows_matmul(i_hyp_t, lat, tile_i, out_dtype, vmem_limit)
    u_ret = _rows_matmul(u_hyp_t, lat, tile_u, out_dtype, vmem_limit)

    return u_ret[:n_users, :dim], i_ret[:n_items, :dim]


# ---------------------------------------------------------------------------
# Pure-JAX reference and test harness.
# ---------------------------------------------------------------------------
def _reference(i_hyper, u_hyper, item_embs, n_layers):
    mm = functools.partial(jnp.matmul, precision=jax.lax.Precision.HIGHEST)
    i_ret = item_embs
    u_ret = None
    for _ in range(n_layers):
        lat = mm(i_hyper.T, i_ret)
        i_ret = mm(i_hyper, lat)
        u_ret = mm(u_hyper, lat)
    return u_ret, i_ret


def _rel_err(a, b):
    a = jnp.asarray(a, jnp.float32)
    b = jnp.asarray(b, jnp.float32)
    return float(jnp.linalg.norm(a - b) / (jnp.linalg.norm(b) + 1e-12))


if __name__ == "__main__":
    fn = jax.jit(hgnn_layer, static_argnums=(3,),
                 static_argnames=("row_tile", "compute_dtype", "lat_splits"))

    key = jax.random.PRNGKey(0)
    k1, k2, k3, k4, k5, k6 = jax.random.split(key, 6)

    # --- Test 1: aligned shapes, f32 MXU path --------------------------------
    n_items, n_users, n_hyper, dim, n_layers = 64, 32, 16, 128, 2
    i_hyper = jax.random.uniform(k1, (n_items, n_hyper), dtype=jnp.float32)
    u_hyper = jax.random.uniform(k2, (n_users, n_hyper), dtype=jnp.float32)
    item_embs = jax.random.normal(k3, (n_items, dim), dtype=jnp.float32)
    u_ref, i_ref = _reference(i_hyper, u_hyper, item_embs, n_layers)

    u32, i32 = fn(i_hyper, u_hyper, item_embs, n_layers,
                  compute_dtype=jnp.float32)
    jax.block_until_ready((u32, i32))
    assert _rel_err(u32, u_ref) < 2e-2, ("u_ret f32", _rel_err(u32, u_ref))
    assert _rel_err(i32, i_ref) < 2e-2, ("i_ret f32", _rel_err(i32, i_ref))

    # --- Test 2: default bf16 fast path (f32 accumulation) -------------------
    u16, i16 = fn(i_hyper, u_hyper, item_embs, n_layers)
    jax.block_until_ready((u16, i16))
    assert _rel_err(u16, u_ref) < 5e-2, ("u_ret bf16", _rel_err(u16, u_ref))
    assert _rel_err(i16, i_ref) < 5e-2, ("i_ret bf16", _rel_err(i16, i_ref))

    # --- Test 3: ragged shapes, multi-tile reduction + split axis ------------
    ih2 = jax.random.uniform(k4, (600, 24), dtype=jnp.float32)
    uh2 = jax.random.uniform(k5, (200, 24), dtype=jnp.float32)
    ie2 = jax.random.normal(k6, (600, 80), dtype=jnp.float32)
    u2, i2 = fn(ih2, uh2, ie2, 3, row_tile=128, compute_dtype=jnp.float32)
    jax.block_until_ready((u2, i2))
    u2r, i2r = _reference(ih2, uh2, ie2, 3)
    assert _rel_err(u2, u2r) < 2e-2, ("u_ret ragged", _rel_err(u2, u2r))
    assert _rel_err(i2, i2r) < 2e-2, ("i_ret ragged", _rel_err(i2, i2r))

    print("KERNEL_OK")
</pallas_src>

<mosaic_0001>
module attributes {stable_mosaic.version = 11 : i64} {
  func.func @_rows_kernel(%arg0: i32, %arg1: memref<16x128xf32, #tpu.memory_space<vmem>>, %arg2: memref<16x128xf32, #tpu.memory_space<vmem>>, %arg3: memref<128x128xf32, #tpu.memory_space<vmem>>) attributes {dimension_semantics = [#tpu.dimension_semantics<parallel>], iteration_bounds = array<i64: 1>, scalar_prefetch = 0 : i64, scratch_operands = 0 : i64, tpu.core_type = #tpu.core_type<tc>, window_params = [{transform_indices = @transform_0, window_bounds = array<i64: 16, 128>}, {pipeline_mode = #tpu.pipeline_mode<synchronous>, transform_indices = @transform_1, window_bounds = array<i64: 16, 128>}, {transform_indices = @transform_2, window_bounds = array<i64: 128, 128>}]} {
    %c0 = arith.constant 0 : index
    %c0_0 = arith.constant 0 : index
    %0 = vector.load %arg1[%c0, %c0_0] : memref<16x128xf32, #tpu.memory_space<vmem>>, vector<16x128xf32>
    %c0_1 = arith.constant 0 : index
    %c0_2 = arith.constant 0 : index
    %1 = vector.load %arg2[%c0_1, %c0_2] : memref<16x128xf32, #tpu.memory_space<vmem>>, vector<16x128xf32>
    %cst = arith.constant dense<0.000000e+00> : vector<128x128xf32>
    %2 = tpu.matmul %0, %1, %cst {dimension_numbers = #tpu.dot_dimension_numbers<[0], [0], [1], [1], [0, 1, 1, 1], [], []>} : vector<16x128xf32>, vector<16x128xf32>, vector<128x128xf32> -> vector<128x128xf32>
    %c0_3 = arith.constant 0 : index
    %c0_4 = arith.constant 0 : index
    %3 = vector.load %arg3[%c0_3, %c0_4] : memref<128x128xf32, #tpu.memory_space<vmem>>, vector<128x128xf32>
    tpu.vector_store %arg3[%c0_3, %c0_4], %2 {strides = array<i32>} : memref<128x128xf32, #tpu.memory_space<vmem>>, vector<128x128xf32>,
    return
  }
  func.func @transform_0(%arg0: i32) -> (i32, i32) {
    %c0_i32 = arith.constant 0 : i32
    %c0_i32_0 = arith.constant 0 : i32
    return %c0_i32, %arg0 : i32, i32
  }
  func.func @transform_1(%arg0: i32) -> (i32, i32) {
    %c0_i32 = arith.constant 0 : i32
    %c0_i32_0 = arith.constant 0 : i32
    %c0_i32_1 = arith.constant 0 : i32
    return %c0_i32, %c0_i32_0 : i32, i32
  }
  func.func @transform_2(%arg0: i32) -> (i32, i32) {
    %c0_i32 = arith.constant 0 : i32
    %c0_i32_0 = arith.constant 0 : i32
    return %arg0, %c0_i32 : i32, i32
  }
}

module attributes {stable_mosaic.version = 11 : i64} {
  func.func @_lat_gram_kernel(%arg0: i32, %arg1: i32, %arg2: memref<16x128xf32, #tpu.memory_space<vmem>>, %arg3: memref<128x128xf32, #tpu.memory_space<vmem>>, %arg4: memref<1x16x128xf32, #tpu.memory_space<vmem>>, %arg5: memref<1x16x16xf32, #tpu.memory_space<vmem>>, %arg6: memref<16x128xf32, #tpu.memory_space<vmem>>, %arg7: memref<16x16xf32, #tpu.memory_space<vmem>>) attributes {dimension_semantics = [#tpu.dimension_semantics<parallel>, #tpu.dimension_semantics<arbitrary>], iteration_bounds = array<i64: 1, 1>, scalar_prefetch = 0 : i64, scratch_operands = 2 : i64, tpu.core_type = #tpu.core_type<tc>, window_params = [{transform_indices = @transform_0, window_bounds = array<i64: 16, 128>}, {transform_indices = @transform_1, window_bounds = array<i64: 128, 128>}, {transform_indices = @transform_2, window_bounds = array<i64: 1, 16, 128>}, {transform_indices = @transform_3, window_bounds = array<i64: 1, 16, 16>}]} {
    %c0_i32 = arith.constant 0 : i32
    %0 = arith.cmpi eq, %arg1, %c0_i32 : i32
    %1 = arith.extui %0 : i1 to i32
    %c0_i32_0 = arith.constant 0 : i32
    %2 = arith.cmpi ne, %1, %c0_i32_0 : i32
    scf.if %2 {
      %cst_15 = arith.constant 0.000000e+00 : f32
      %16 = vector.broadcast %cst_15 : f32 to vector<16x128xf32>
      %c0_16 = arith.constant 0 : index
      %c0_17 = arith.constant 0 : index
      %17 = vector.load %arg6[%c0_16, %c0_17] : memref<16x128xf32, #tpu.memory_space<vmem>>, vector<16x128xf32>
      tpu.vector_store %arg6[%c0_16, %c0_17], %16 {strides = array<i32>} : memref<16x128xf32, #tpu.memory_space<vmem>>, vector<16x128xf32>,
      %cst_18 = arith.constant 0.000000e+00 : f32
      %18 = vector.broadcast %cst_18 : f32 to vector<16x16xf32>
      %c0_19 = arith.constant 0 : index
      %c0_20 = arith.constant 0 : index
      %19 = vector.load %arg7[%c0_19, %c0_20] : memref<16x16xf32, #tpu.memory_space<vmem>>, vector<16x16xf32>
      tpu.vector_store %arg7[%c0_19, %c0_20], %18 {strides = array<i32>} : memref<16x16xf32, #tpu.memory_space<vmem>>, vector<16x16xf32>,
    } else {
    }
    %c0 = arith.constant 0 : index
    %c0_1 = arith.constant 0 : index
    %3 = vector.load %arg2[%c0, %c0_1] : memref<16x128xf32, #tpu.memory_space<vmem>>, vector<16x128xf32>
    %c0_2 = arith.constant 0 : index
    %c0_3 = arith.constant 0 : index
    %4 = vector.load %arg6[%c0_2, %c0_3] : memref<16x128xf32, #tpu.memory_space<vmem>>, vector<16x128xf32>
    %c0_4 = arith.constant 0 : index
    %c0_5 = arith.constant 0 : index
    %5 = vector.load %arg3[%c0_4, %c0_5] : memref<128x128xf32, #tpu.memory_space<vmem>>, vector<128x128xf32>
    %cst = arith.constant dense<0.000000e+00> : vector<16x128xf32>
    %6 = tpu.matmul %3, %5, %cst {dimension_numbers = #tpu.dot_dimension_numbers<[1], [0], [0], [1], [0, 0, 1, 1], [], []>} : vector<16x128xf32>, vector<128x128xf32>, vector<16x128xf32> -> vector<16x128xf32>
    %7 = arith.addf %4, %6 : vector<16x128xf32>
    %c0_6 = arith.constant 0 : index
    %c0_7 = arith.constant 0 : index
    %8 = vector.load %arg6[%c0_6, %c0_7] : memref<16x128xf32, #tpu.memory_space<vmem>>, vector<16x128xf32>
    tpu.vector_store %arg6[%c0_6, %c0_7], %7 {strides = array<i32>} : memref<16x128xf32, #tpu.memory_space<vmem>>, vector<16x128xf32>,
    %c0_8 = arith.constant 0 : index
    %c0_9 = arith.constant 0 : index
    %9 = vector.load %arg7[%c0_8, %c0_9] : memref<16x16xf32, #tpu.memory_space<vmem>>, vector<16x16xf32>
    %cst_10 = arith.constant dense<0.000000e+00> : vector<16x16xf32>
    %10 = tpu.matmul %3, %3, %cst_10 {dimension_numbers = #tpu.dot_dimension_numbers<[1], [1], [0], [0], [0, 0, 1, 0], [], []>} : vector<16x128xf32>, vector<16x128xf32>, vector<16x16xf32> -> vector<16x16xf32>
    %11 = arith.addf %9, %10 : vector<16x16xf32>
    %c0_11 = arith.constant 0 : index
    %c0_12 = arith.constant 0 : index
    %12 = vector.load %arg7[%c0_11, %c0_12] : memref<16x16xf32, #tpu.memory_space<vmem>>, vector<16x16xf32>
    tpu.vector_store %arg7[%c0_11, %c0_12], %11 {strides = array<i32>} : memref<16x16xf32, #tpu.memory_space<vmem>>, vector<16x16xf32>,
    %c0_i32_13 = arith.constant 0 : i32
    %13 = arith.cmpi eq, %arg1, %c0_i32_13 : i32
    %14 = arith.extui %13 : i1 to i32
    %c0_i32_14 = arith.constant 0 : i32
    %15 = arith.cmpi ne, %14, %c0_i32_14 : i32
    scf.if %15 {
      %c0_15 = arith.constant 0 : index
      %c0_16 = arith.constant 0 : index
      %16 = vector.load %arg6[%c0_15, %c0_16] : memref<16x128xf32, #tpu.memory_space<vmem>>, vector<16x128xf32>
      %c0_17 = arith.constant 0 : index
      %c0_18 = arith.constant 0 : index
      %c0_19 = arith.constant 0 : index
      %17 = vector.load %arg4[%c0_17, %c0_18, %c0_19] : memref<1x16x128xf32, #tpu.memory_space<vmem>>, vector<1x16x128xf32>
      %18 = vector.shape_cast %17 : vector<1x16x128xf32> to vector<16x128xf32>
      %19 = vector.shape_cast %16 : vector<16x128xf32> to vector<1x16x128xf32>
      tpu.vector_store %arg4[%c0_17, %c0_18, %c0_19], %19 {strides = array<i32>} : memref<1x16x128xf32, #tpu.memory_space<vmem>>, vector<1x16x128xf32>,
      %c0_20 = arith.constant 0 : index
      %c0_21 = arith.constant 0 : index
      %20 = vector.load %arg7[%c0_20, %c0_21] : memref<16x16xf32, #tpu.memory_space<vmem>>, vector<16x16xf32>
      %c0_22 = arith.constant 0 : index
      %c0_23 = arith.constant 0 : index
      %c0_24 = arith.constant 0 : index
      %21 = vector.load %arg5[%c0_22, %c0_23, %c0_24] : memref<1x16x16xf32, #tpu.memory_space<vmem>>, vector<1x16x16xf32>
      %22 = vector.shape_cast %21 : vector<1x16x16xf32> to vector<16x16xf32>
      %23 = vector.shape_cast %20 : vector<16x16xf32> to vector<1x16x16xf32>
      tpu.vector_store %arg5[%c0_22, %c0_23, %c0_24], %23 {strides = array<i32>} : memref<1x16x16xf32, #tpu.memory_space<vmem>>, vector<1x16x16xf32>,
    } else {
    }
    return
  }
  func.func @transform_0(%arg0: i32, %arg1: i32) -> (i32, i32) {
    %c1_i32 = arith.constant 1 : i32
    %0 = arith.muli %arg0, %c1_i32 : i32
    %1 = arith.addi %0, %arg1 : i32
    %c0_i32 = arith.constant 0 : i32
    %c0_i32_0 = arith.constant 0 : i32
    return %c0_i32, %1 : i32, i32
  }
  func.func @transform_1(%arg0: i32, %arg1: i32) -> (i32, i32) {
    %c1_i32 = arith.constant 1 : i32
    %0 = arith.muli %arg0, %c1_i32 : i32
    %1 = arith.addi %0, %arg1 : i32
    %c0_i32 = arith.constant 0 : i32
    %c0_i32_0 = arith.constant 0 : i32
    return %1, %c0_i32 : i32, i32
  }
  func.func @transform_2(%arg0: i32, %arg1: i32) -> (i32, i32, i32) {
    %c0_i32 = arith.constant 0 : i32
    %c0_i32_0 = arith.constant 0 : i32
    %c0_i32_1 = arith.constant 0 : i32
    return %arg0, %c0_i32, %c0_i32_0 : i32, i32, i32
  }
  func.func @transform_3(%arg0: i32, %arg1: i32) -> (i32, i32, i32) {
    %c0_i32 = arith.constant 0 : i32
    %c0_i32_0 = arith.constant 0 : i32
    %c0_i32_1 = arith.constant 0 : i32
    return %arg0, %c0_i32, %c0_i32_0 : i32, i32, i32
  }
}

</mosaic_0001>

<bundles_post_ra>
// kernel: hgnn_layer.4
= control target key start
LH: loop header
LB: loop body
LE: loop exit
PB: predicated region body
PF: predicated region fallthrough
CT: control target
= control target key end

     0   :  { %vm47_vm0 = vcmask 130048   ;;  %s295_s0 = inlined_call_operand.vmem [shape: f32[16,128], index: 0, kind: input, shape index: {}]   ;;  %s296_s1 = inlined_call_operand.vmem [shape: f32[16,128], index: 1, kind: input, shape index: {}]   ;;  %s297_s2 = inlined_call_operand.vmem [shape: f32[128,128], index: 2, kind: output, shape index: {}]  }
   0x1   :  { %v11_v0 = vld [vmem:[%s295_s0] sm:$0xff]  ;;  %v14_v1 = vld [vmem:[%s296_s1 + $0x8] sm:$0xff] }
   0x2   :  { %15 = vxpose.xlu0.b32.start [1/2] (short) %v11_v0, 128  ;;  %110 = vmatpush.msra.mxu0 %v14_v1  ;;  %v13_v2 = vld [vmem:[%s296_s1] sm:$0xff]  ;;  %v12_v3 = vld [vmem:[%s295_s0 + $0x8] sm:$0xff] }
   0x3   :  { %197 = vmatpush.msra.mxu1 %v14_v1  ;;  %198 = vmatpush.msra.mxu2 %v14_v1 }
   0x4   :  { %111 = vmatpush.msra.mxu0 %v13_v2  ;;  %199 = vmatpush.msra.mxu3 %v14_v1 }
   0x5   :  { %200 = vmatpush.msra.mxu1 %v13_v2  ;;  %201 = vmatpush.msra.mxu2 %v13_v2 }
   0x6   :  { %202 = vmatpush.msra.mxu3 %v13_v2 }
   0xa   :  { %16 = vxpose.xlu0.b32.end [2/2] (short) %v12_v3, 128 }
  0xa6   :  { %v31_v4 = vpop.trf.xlu0 }
  0xa7   :  { %181 = vmatmul.msk.f32.vlgmr.msra.gmra.mxu0 %vm47_vm0, %v31_v4 }
  0xae   :  { %v32_v5 = vpop.trf.xlu0 }
  0xaf   :  { %182 = vmatmul.msk.f32.gmra.mxu0 %vm47_vm0, %v32_v5 }
  0xb6   :  { %v33_v6 = vpop.trf.xlu0 }
  0xb7   :  { %183 = vmatmul.msk.f32.gmra.mxu0 %vm47_vm0, %v33_v6 }
  0xbe   :  { %v34_v7 = vpop.trf.xlu0 }
  0xbf   :  { %184 = vmatmul.msk.f32.gmra.mxu0 %vm47_vm0, %v34_v7 }
  0xc6   :  { %v35_v8 = vpop.trf.xlu0 }
  0xc7   :  { %185 = vmatmul.msk.f32.vlgmr.msra.gmra.mxu1 %vm47_vm0, %v35_v8 }
  0xce   :  { %v36_v9 = vpop.trf.xlu0 }
  0xcf   :  { %186 = vmatmul.msk.f32.gmra.mxu1 %vm47_vm0, %v36_v9 }
  0xd6   :  { %v37_v10 = vpop.trf.xlu0 }
  0xd7   :  { %187 = vmatmul.msk.f32.gmra.mxu1 %vm47_vm0, %v37_v10 }
  0xde   :  { %v38_v11 = vpop.trf.xlu0 }
  0xdf   :  { %188 = vmatmul.msk.f32.gmra.mxu1 %vm47_vm0, %v38_v11 }
  0xe6   :  { %v39_v12 = vpop.trf.xlu0 }
  0xe7   :  { %189 = vmatmul.msk.f32.vlgmr.msra.gmra.mxu2 %vm47_vm0, %v39_v12 }
  0xee   :  { %v40_v13 = vpop.trf.xlu0 }
  0xef   :  { %190 = vmatmul.msk.f32.gmra.mxu2 %vm47_vm0, %v40_v13 }
  0xf6   :  { %v41_v14 = vpop.trf.xlu0 }
  0xf7   :  { %191 = vmatmul.msk.f32.gmra.mxu2 %vm47_vm0, %v41_v14 }
  0xfe   :  { %v42_v15 = vpop.trf.xlu0 }
  0xff   :  { %192 = vmatmul.msk.f32.gmra.mxu2 %vm47_vm0, %v42_v15 }
 0x106   :  { %v43_v16 = vpop.trf.xlu0 }
 0x107   :  { %193 = vmatmul.msk.f32.vlgmr.msra.gmra.mxu3 %vm47_vm0, %v43_v16 }
 0x10e   :  { %v44_v17 = vpop.trf.xlu0 }
 0x10f   :  { %194 = vmatmul.msk.f32.gmra.mxu3 %vm47_vm0, %v44_v17 }
 0x116   :  { %v45_v18 = vpop.trf.xlu0 }
 0x117   :  { %195 = vmatmul.msk.f32.gmra.mxu3 %vm47_vm0, %v45_v18 }
 0x11e   :  { %v46_v19 = vpop.trf.xlu0 }
 0x11f   :  { %196 = vmatmul.msk.f32.gmra.mxu3 %vm47_vm0, %v46_v19 }
 0x124   :  { %v113_v20 = vpop.f32.mrf.mxu0 }
 0x125   :  { %161 = vst [vmem:[%s297_s2] sm:$0xff] %v113_v20 }
 0x12c   :  { %v116_v21 = vpop.f32.mrf.mxu0 }
 0x12d   :  { %162 = vst [vmem:[%s297_s2 + $0x8] sm:$0xff] %v116_v21 }
 0x134   :  { %v119_v22 = vpop.f32.mrf.mxu0 }
 0x135   :  { %163 = vst [vmem:[%s297_s2 + $0x10] sm:$0xff] %v119_v22 }
 0x13c   :  { %v122_v23 = vpop.f32.mrf.mxu0 }
 0x13d   :  { %164 = vst [vmem:[%s297_s2 + $0x18] sm:$0xff] %v122_v23 }
 0x144   :  { %v125_v24 = vpop.f32.mrf.mxu1 }
 0x145   :  { %165 = vst [vmem:[%s297_s2 + $0x20] sm:$0xff] %v125_v24 }
 0x14c   :  { %v128_v25 = vpop.f32.mrf.mxu1 }
 0x14d   :  { %166 = vst [vmem:[%s297_s2 + $0x28] sm:$0xff] %v128_v25 }
 0x154   :  { %v131_v26 = vpop.f32.mrf.mxu1 }
 0x155   :  { %167 = vst [vmem:[%s297_s2 + $0x30] sm:$0xff] %v131_v26 }
 0x15c   :  { %v134_v27 = vpop.f32.mrf.mxu1 }
 0x15d   :  { %168 = vst [vmem:[%s297_s2 + $0x38] sm:$0xff] %v134_v27 }
 0x16a   :  { %v137_v28 = vpop.f32.mrf.mxu2 }
 0x16b   :  { %169 = vst [vmem:[%s297_s2 + $0x40] sm:$0xff] %v137_v28 }
 0x172   :  { %v140_v29 = vpop.f32.mrf.mxu2 }
 0x173   :  { %170 = vst [vmem:[%s297_s2 + $0x48] sm:$0xff] %v140_v29 }
 0x17a   :  { %v143_v30 = vpop.f32.mrf.mxu2 }
 0x17b   :  { %171 = vst [vmem:[%s297_s2 + $0x50] sm:$0xff] %v143_v30 }
 0x182   :  { %v146_v31 = vpop.f32.mrf.mxu2 }
 0x183   :  { %172 = vst [vmem:[%s297_s2 + $0x58] sm:$0xff] %v146_v31 }
 0x18a   :  { %v149_v32 = vpop.f32.mrf.mxu3 }
 0x18b   :  { %173 = vst [vmem:[%s297_s2 + $0x60] sm:$0xff] %v149_v32 }
 0x192   :  { %v152_v33 = vpop.f32.mrf.mxu3 }
 0x193   :  { %174 = vst [vmem:[%s297_s2 + $0x68] sm:$0xff] %v152_v33 }
 0x19a   :  { %v155_v34 = vpop.f32.mrf.mxu3 }
 0x19b   :  { %175 = vst [vmem:[%s297_s2 + $0x70] sm:$0xff] %v155_v34 }
 0x1a2   :  { %v158_v35 = vpop.f32.mrf.mxu3 }
 0x1a3   :  { %176 = vst [vmem:[%s297_s2 + $0x78] sm:$0xff] %v158_v35 }

// kernel: hgnn_layer.3
= control target key start
LH: loop header
LB: loop body
LE: loop exit
PB: predicated region body
PF: predicated region fallthrough
CT: control target
= control target key end

     0   :  { %vm58_vm0 = vcmask 130048   ;;  %v186_v2 = vmov 0.0   ;;  %s279_s1 = inlined_call_operand.vmem [shape: f32[128,128], index: 1, kind: input, shape index: {}]   ;;  %s280_s0 = inlined_call_operand.vmem [shape: f32[16,128], index: 0, kind: input, shape index: {}]   ;;  %s281_s3 = inlined_call_operand.vmem [shape: f32[1,16,16], index: 3, kind: output, shape index: {1}]   ;;  %s282_s2 = inlined_call_operand.vmem [shape: f32[1,16,128], index: 2, kind: output, shape index: {0}]  }
   0x1   :  { %v80_v0 = vld [vmem:[%s279_s1 + $0x78] sm:$0xff]  ;;  %v79_v1 = vld [vmem:[%s279_s1 + $0x70] sm:$0xff]  ;;  %59 = vst.msk [vmem:[#allocation3] sm:$0xff] %vm58_vm0, %v186_v2  ;;  %v78_v3 = vld [vmem:[%s279_s1 + $0x68] sm:$0xff] }
   0x2   :  { %169 = vmatpush.msra.mxu2 %v80_v0  ;;  %81 = vmatpush.msra.mxu0 %v80_v0  ;;  %v62_v4 = vld [vmem:[%s280_s0 + $0x8] sm:$0xff]  ;;  %60 = vst.msk [vmem:[#allocation3 + $0x8] sm:$0xff] %vm58_vm0, %v186_v2  ;;  %v77_v5 = vld [vmem:[%s279_s1 + $0x60] sm:$0xff]  ;;  %v76_v7 = vld [vmem:[%s279_s1 + $0x58] sm:$0xff] }
   0x3   :  { %124 = vmatpush.xpose.msra.mxu1 %v62_v4  ;;  %v61_v6 = vld [vmem:[%s280_s0] sm:$0xff]  ;;  %v75_v8 = vld [vmem:[%s279_s1 + $0x50] sm:$0xff]  ;;  %v74_v9 = vld [vmem:[%s279_s1 + $0x48] sm:$0xff] }
   0x4   :  { %170 = vmatpush.msra.mxu2 %v79_v1  ;;  %82 = vmatpush.msra.mxu0 %v79_v1  ;;  %v73_v10 = vld [vmem:[%s279_s1 + $0x40] sm:$0xff]  ;;  %v72_v11 = vld [vmem:[%s279_s1 + $0x38] sm:$0xff]  ;;  %v71_v12 = vld [vmem:[%s279_s1 + $0x30] sm:$0xff] }
   0x5   :  { %v70_v13 = vld [vmem:[%s279_s1 + $0x28] sm:$0xff]  ;;  %v69_v14 = vld [vmem:[%s279_s1 + $0x20] sm:$0xff]  ;;  %v68_v15 = vld [vmem:[%s279_s1 + $0x18] sm:$0xff] }
   0x6   :  { %171 = vmatpush.msra.mxu2 %v78_v3  ;;  %83 = vmatpush.msra.mxu0 %v78_v3  ;;  %v67_v16 = vld [vmem:[%s279_s1 + $0x10] sm:$0xff]  ;;  %v66_v17 = vld [vmem:[%s279_s1 + $0x8] sm:$0xff]  ;;  %v65_v18 = vld [vmem:[%s279_s1] sm:$0xff] }
   0x7   :  { %125 = vmatpush.xpose.msra.mxu1 %v61_v6 }
   0x8   :  { %172 = vmatpush.msra.mxu2 %v77_v5  ;;  %84 = vmatpush.msra.mxu0 %v77_v5  ;;  %v108_v19 = vld [vmem:[#allocation3] sm:$0xff] }
   0x9   :  { %v109_v22 = vld [vmem:[#allocation3 + $0x8] sm:$0xff] }
   0xa   :  { %173 = vmatpush.msra.mxu2 %v76_v7  ;;  %85 = vmatpush.msra.mxu0 %v76_v7 }
   0xb   :  { %126 = vmatmul.f32.vlgmr.msra.gmra.mxu1 %v61_v6 }
   0xc   :  { %174 = vmatpush.msra.mxu2 %v75_v8  ;;  %86 = vmatpush.msra.mxu0 %v75_v8 }
   0xe   :  { %175 = vmatpush.msra.mxu2 %v74_v9  ;;  %87 = vmatpush.msra.mxu0 %v74_v9 }
  0x10   :  { %176 = vmatpush.msra.mxu2 %v73_v10  ;;  %88 = vmatpush.msra.mxu0 %v73_v10 }
  0x12   :  { %177 = vmatpush.msra.mxu2 %v72_v11  ;;  %89 = vmatpush.msra.mxu0 %v72_v11 }
  0x13   :  { %129 = vmatmul.f32.gmra.mxu1 %v62_v4 }
  0x14   :  { %178 = vmatpush.msra.mxu2 %v71_v12  ;;  %90 = vmatpush.msra.mxu0 %v71_v12 }
  0x16   :  { %179 = vmatpush.msra.mxu2 %v70_v13  ;;  %91 = vmatpush.msra.mxu0 %v70_v13 }
  0x18   :  { %180 = vmatpush.msra.mxu2 %v69_v14  ;;  %92 = vmatpush.msra.mxu0 %v69_v14 }
  0x1a   :  { %181 = vmatpush.msra.mxu2 %v68_v15  ;;  %93 = vmatpush.msra.mxu0 %v68_v15 }
  0x1c   :  { %182 = vmatpush.msra.mxu2 %v67_v16  ;;  %94 = vmatpush.msra.mxu0 %v67_v16 }
  0x1e   :  { %183 = vmatpush.msra.mxu2 %v66_v17  ;;  %95 = vmatpush.msra.mxu0 %v66_v17 }
  0x20   :  { %184 = vmatpush.msra.mxu2 %v65_v18  ;;  %96 = vmatpush.msra.mxu0 %v65_v18 }
  0x21   :  { %100 = vmatmul.f32.vlgmr.msra.gmra.mxu2 %v62_v4  ;;  %97 = vmatmul.f32.vlgmr.msra.gmra.mxu0 %v61_v6 }
  0x88   :  { %v127_v20 = vpop.f32.mrf.mxu1 }
  0x89   :  { %v133_v21 = vadd.f32 %v127_v20, %v108_v19 }
  0x8b   :  { %136 = vst.msk [vmem:[#allocation3] sm:$0xff] %vm58_vm0, %v133_v21 }
  0x90   :  { %v130_v23 = vpop.f32.mrf.mxu1 }
  0x91   :  { %v134_v24 = vadd.f32 %v130_v23, %v109_v22 }
  0x92   :  { %v145_v25 = vld [vmem:[#allocation3] sm:$0xff] }
  0x93   :  { %147 = vst.msk [vmem:[%s281_s3] sm:$0xff] %vm58_vm0, %v145_v25 }
  0x94   :  { %137 = vst.msk [vmem:[#allocation3 + $0x8] sm:$0xff] %vm58_vm0, %v134_v24 }
  0x9b   :  { %v146_v26 = vld [vmem:[#allocation3 + $0x8] sm:$0xff] }
  0x9c   :  { %148 = vst.msk [vmem:[%s281_s3 + $0x8] sm:$0xff] %vm58_vm0, %v146_v26 }
  0x9e   :  { %v98_v27 = vpop.f32.mrf.mxu0 }
  0x9f   :  { %143 = vst [vmem:[%s282_s2] sm:$0xff] %v98_v27 }
  0xa4   :  { %v101_v28 = vpop.f32.mrf.mxu2 }
  0xa5   :  { %144 = vst [vmem:[%s282_s2 + $0x8] sm:$0xff] %v101_v28 }

</bundles_post_ra>
